<compile_context>
chip_gen: v7x
topology: tpu7x:2x2x1
jax: 0.10.0
libtpu: 0.0.40
codegen_flags: <defaults>
</compile_context>

<pallas_src>
import jax
import jax.numpy as jnp
from jax import lax
from jax.experimental import pallas as pl
from jax.experimental.pallas import tpu as pltpu


def _round_up(v, m):
    return ((v + m - 1) // m) * m


def _make_glvq_kernel(tb, pc, n_pchunks, b_real):
    """Closure values are static Python ints only (no recompiles per value)."""

    def kernel(alpha_ref, x_ref, pt_ref, psq_ref, y_ref, out_ref, d1_ref, d2_ref):
        i = pl.program_id(0)          # batch tile
        j = pl.program_id(1)          # prototype chunk (reduction axis)

        @pl.when(j == 0)
        def _():
            d1_ref[...] = jnp.zeros_like(d1_ref)
            d2_ref[...] = jnp.full_like(d2_ref, jnp.inf)

        # Shifted squared distances for this prototype chunk:
        #   dist[:, c] - ||x||^2 = ||p_c||^2 - 2 <x, p_c>
        # ||x||^2 is common to every column, so it is added back once at
        # finalize; this removes a (tb, pc) broadcast-add + clamp per chunk.
        xp = jnp.dot(x_ref[...], pt_ref[...], preferred_element_type=jnp.float32)
        pdist = psq_ref[...] - 2.0 * xp                        # (tb, pc)

        # (1, pc) iota broadcast against y (tb, 1). Padded prototype columns
        # carry a 1e30 sentinel in psq -> no explicit valid-column mask.
        col = lax.broadcasted_iota(jnp.int32, (1, pc), 1) + j * pc
        correct = col == y_ref[...]                            # (tb, pc)

        # Exactly one column matches y across all chunks -> sum-accumulate d1.
        d1_ref[...] += jnp.sum(jnp.where(correct, pdist, 0.0),
                               axis=1, keepdims=True)
        d2_ref[...] = jnp.minimum(
            d2_ref[...],
            jnp.min(jnp.where(correct, jnp.inf, pdist), axis=1, keepdims=True))

        @pl.when(j == n_pchunks - 1)
        def _():
            x = x_ref[...]
            xsq = jnp.sum(x * x, axis=1, keepdims=True)        # (tb, 1)
            d1 = jnp.maximum(d1_ref[...] + xsq, 0.0)
            d2 = jnp.maximum(d2_ref[...] + xsq, 0.0)
            mu = (d1 - d2) / (d1 + d2)
            alpha = alpha_ref[0, 0]
            f_mu = 1.0 / (1.0 + jnp.exp(alpha * mu))           # sigmoid(-alpha*mu)
            # Mask rows of the (possibly ragged) last batch tile; select does
            # not propagate NaN from the garbage rows.
            row = lax.broadcasted_iota(jnp.int32, (tb, 1), 0) + i * tb
            out_ref[0, 0] = jnp.sum(jnp.where(row < b_real, f_mu, 0.0))

    return kernel


def glvq_forward(x, prototypes, y, alpha=1.0, tb=512, pc=512):
    """x: (B, D) f32, prototypes: (P, D) f32, y: (B,) i32 -> scalar f32 loss."""
    x = jnp.asarray(x, jnp.float32)
    prototypes = jnp.asarray(prototypes, jnp.float32)
    y = jnp.asarray(y, jnp.int32)
    b, d = x.shape
    p, _ = prototypes.shape

    # Prototype axis: lane-dense chunks (multiple of 128).
    pc = min(_round_up(p, 128), _round_up(int(pc), 128))
    p_pad = _round_up(p, pc)
    n_pchunks = p_pad // pc

    # Batch axis: sublane-aligned tile; ragged last tile is masked in-kernel
    # (no wrapper-side padded copy of x / y -> no extra HBM pass over x).
    tb = max(8, min(_round_up(int(tb), 8), _round_up(b, 8)))
    n_btiles = pl.cdiv(b, tb)

    # Hoisted prototype preprocessing (tiny; reused across every batch tile).
    pt = jnp.zeros((d, p_pad), jnp.float32).at[:, :p].set(prototypes.T)
    psq = jnp.full((1, p_pad), 1e30, jnp.float32).at[0, :p].set(
        jnp.sum(prototypes * prototypes, axis=1))
    alpha_arr = jnp.full((1, 1), alpha, dtype=jnp.float32)
    y2 = y.reshape(b, 1)

    kernel = _make_glvq_kernel(tb, pc, n_pchunks, b)

    cost = pl.CostEstimate(
        flops=2 * n_btiles * tb * p_pad * d,
        transcendentals=n_btiles * tb,
        bytes_accessed=(b * d + n_btiles * (d * p_pad + p_pad) + 2 * b) * 4,
    )

    partial = pl.pallas_call(
        kernel,
        out_shape=jax.ShapeDtypeStruct((n_btiles, 1), jnp.float32),
        grid=(n_btiles, n_pchunks),
        in_specs=[
            # alpha: tiny scalar, SMEM-resident.
            pl.BlockSpec((1, 1), lambda i, j: (0, 0),
                         memory_space=pltpu.MemorySpace.SMEM),
            # x: batch tile; index constant across j -> fetched once per tile.
            pl.BlockSpec((tb, d), lambda i, j: (i, 0)),
            # prototypes^T and ||p||^2: chunked along the inner grid axis.
            pl.BlockSpec((d, pc), lambda i, j: (0, j)),
            pl.BlockSpec((1, pc), lambda i, j: (0, j)),
            # labels: batch tile.
            pl.BlockSpec((tb, 1), lambda i, j: (i, 0)),
        ],
        # Per-batch-tile partial sums -> batch axis can be "parallel".
        out_specs=pl.BlockSpec((1, 1), lambda i, j: (i, 0),
                               memory_space=pltpu.MemorySpace.SMEM),
        scratch_shapes=[pltpu.VMEM((tb, 1), jnp.float32),   # running d1 partial
                        pltpu.VMEM((tb, 1), jnp.float32)],  # running d2 partial
        compiler_params=pltpu.CompilerParams(
            dimension_semantics=("parallel", "arbitrary")),
        cost_estimate=cost,
    )(alpha_arr, x, pt, psq, y2)

    return jnp.sum(partial) / b


def glvq_reference(x, prototypes, y, alpha=1.0):
    """Pure-JAX reference matching the PyTorch module exactly."""
    diff = x[:, None, :] - prototypes[None, :, :]
    dist = jnp.sum(diff * diff, axis=2)                          # (B, P)
    b, p = dist.shape
    correct = lax.broadcasted_iota(jnp.int32, (b, p), 1) == y[:, None]
    d1 = jnp.min(jnp.where(correct, dist, jnp.inf), axis=1)
    d2 = jnp.min(jnp.where(correct, jnp.inf, dist), axis=1)
    mu = (d1 - d2) / (d1 + d2)
    return jnp.mean(jax.nn.sigmoid(-alpha * mu))


if __name__ == "__main__":
    # Small shapes consistent with the module's forward.
    batch = 8
    input_dim = 32
    num_prototypes = 16
    num_classes = 4
    alpha = 1.0

    key = jax.random.PRNGKey(0)
    k_x, k_p, k_y, k_x2, k_y2 = jax.random.split(key, 5)

    x = jax.random.normal(k_x, (batch, input_dim), dtype=jnp.float32)
    prototypes = jax.random.normal(k_p, (num_prototypes, input_dim),
                                   dtype=jnp.float32)
    # prototype_labels[i] = i % num_classes (buffer; not used in forward()).
    prototype_labels = jnp.arange(num_prototypes, dtype=jnp.int32) % num_classes
    y = jax.random.randint(k_y, (batch,), 0, num_classes, dtype=jnp.int32)

    loss = glvq_forward(x, prototypes, y, alpha=alpha)
    loss = jax.block_until_ready(loss)
    ref = glvq_reference(x, prototypes, y, alpha=alpha)
    assert jnp.allclose(loss, ref, rtol=1e-4, atol=1e-4), (loss, ref)

    # Second check: batch not a multiple of the tile -> 3 batch tiles of 8 rows,
    # last tile ragged (handled by the in-kernel row mask, no host-side padding).
    batch2 = 22
    x2 = jax.random.normal(k_x2, (batch2, input_dim), dtype=jnp.float32)
    y2 = jax.random.randint(k_y2, (batch2,), 0, num_classes, dtype=jnp.int32)
    loss2 = glvq_forward(x2, prototypes, y2, alpha=0.5, tb=8)
    loss2 = jax.block_until_ready(loss2)
    ref2 = glvq_reference(x2, prototypes, y2, alpha=0.5)
    assert jnp.allclose(loss2, ref2, rtol=1e-4, atol=1e-4), (loss2, ref2)

    print("KERNEL_OK")
</pallas_src>

<mosaic_0001>
module attributes {stable_mosaic.version = 11 : i64} {
  func.func @kernel(%arg0: i32, %arg1: i32, %arg2: memref<1x1xf32, #tpu.memory_space<smem>>, %arg3: memref<8x32xf32, #tpu.memory_space<vmem>>, %arg4: memref<32x128xf32, #tpu.memory_space<vmem>>, %arg5: memref<1x128xf32, #tpu.memory_space<vmem>>, %arg6: memref<8x1xi32, #tpu.memory_space<vmem>>, %arg7: memref<1x1xf32, #tpu.memory_space<smem>>, %arg8: memref<8x1xf32, #tpu.memory_space<vmem>>, %arg9: memref<8x1xf32, #tpu.memory_space<vmem>>) attributes {dimension_semantics = [#tpu.dimension_semantics<parallel>, #tpu.dimension_semantics<arbitrary>], iteration_bounds = array<i64: 1, 1>, scalar_prefetch = 0 : i64, scratch_operands = 2 : i64, tpu.core_type = #tpu.core_type<tc>, window_params = [{transform_indices = @transform_0, window_bounds = array<i64: 1, 1>}, {transform_indices = @transform_1, window_bounds = array<i64: 8, 32>}, {transform_indices = @transform_2, window_bounds = array<i64: 32, 128>}, {transform_indices = @transform_3, window_bounds = array<i64: 1, 128>}, {transform_indices = @transform_4, window_bounds = array<i64: 8, 1>}, {transform_indices = @transform_5, window_bounds = array<i64: 1, 1>}]} {
    %c0_i32 = arith.constant 0 : i32
    %0 = arith.cmpi eq, %arg1, %c0_i32 : i32
    %1 = arith.extui %0 : i1 to i32
    %c0_i32_0 = arith.constant 0 : i32
    %2 = arith.cmpi ne, %1, %c0_i32_0 : i32
    scf.if %2 {
      %cst_23 = arith.constant 0.000000e+00 : f32
      %36 = vector.broadcast %cst_23 : f32 to vector<8x1xf32>
      %c0_24 = arith.constant 0 : index
      %c0_25 = arith.constant 0 : index
      %37 = vector.load %arg8[%c0_24, %c0_25] : memref<8x1xf32, #tpu.memory_space<vmem>>, vector<8x1xf32>
      tpu.vector_store %arg8[%c0_24, %c0_25], %36 {strides = array<i32>} : memref<8x1xf32, #tpu.memory_space<vmem>>, vector<8x1xf32>,
      %cst_26 = arith.constant 0x7F800000 : f32
      %38 = vector.broadcast %cst_26 : f32 to vector<8x1xf32>
      %c0_27 = arith.constant 0 : index
      %c0_28 = arith.constant 0 : index
      %39 = vector.load %arg9[%c0_27, %c0_28] : memref<8x1xf32, #tpu.memory_space<vmem>>, vector<8x1xf32>
      tpu.vector_store %arg9[%c0_27, %c0_28], %38 {strides = array<i32>} : memref<8x1xf32, #tpu.memory_space<vmem>>, vector<8x1xf32>,
    } else {
    }
    %c0 = arith.constant 0 : index
    %c0_1 = arith.constant 0 : index
    %3 = vector.load %arg3[%c0, %c0_1] : memref<8x32xf32, #tpu.memory_space<vmem>>, vector<8x32xf32>
    %c0_2 = arith.constant 0 : index
    %c0_3 = arith.constant 0 : index
    %4 = vector.load %arg4[%c0_2, %c0_3] : memref<32x128xf32, #tpu.memory_space<vmem>>, vector<32x128xf32>
    %cst = arith.constant dense<0.000000e+00> : vector<8x128xf32>
    %5 = tpu.matmul %3, %4, %cst {dimension_numbers = #tpu.dot_dimension_numbers<[1], [0], [0], [1], [0, 0, 1, 1], [], []>} : vector<8x32xf32>, vector<32x128xf32>, vector<8x128xf32> -> vector<8x128xf32>
    %c0_4 = arith.constant 0 : index
    %c0_5 = arith.constant 0 : index
    %6 = vector.load %arg5[%c0_4, %c0_5] : memref<1x128xf32, #tpu.memory_space<vmem>>, vector<1x128xf32>
    %cst_6 = arith.constant 2.000000e+00 : f32
    %7 = vector.broadcast %cst_6 : f32 to vector<8x128xf32>
    %8 = arith.mulf %7, %5 : vector<8x128xf32>
    %9 = vector.broadcast %6 : vector<1x128xf32> to vector<8x128xf32>
    %10 = arith.subf %9, %8 : vector<8x128xf32>
    %11 = tpu.iota {dimensions = array<i32: 1>} : vector<1x128xi32>
    %c128_i32 = arith.constant 128 : i32
    %12 = arith.muli %arg1, %c128_i32 : i32
    %13 = vector.broadcast %12 : i32 to vector<1x128xi32>
    %14 = arith.addi %11, %13 : vector<1x128xi32>
    %c0_7 = arith.constant 0 : index
    %c0_8 = arith.constant 0 : index
    %15 = vector.load %arg6[%c0_7, %c0_8] : memref<8x1xi32, #tpu.memory_space<vmem>>, vector<8x1xi32>
    %16 = vector.broadcast %14 : vector<1x128xi32> to vector<8x128xi32>
    %17 = vector.broadcast %15 : vector<8x1xi32> to vector<8x128xi32>
    %18 = arith.cmpi eq, %16, %17 : vector<8x128xi32>
    %c0_9 = arith.constant 0 : index
    %c0_10 = arith.constant 0 : index
    %19 = vector.load %arg8[%c0_9, %c0_10] : memref<8x1xf32, #tpu.memory_space<vmem>>, vector<8x1xf32>
    %cst_11 = arith.constant 0.000000e+00 : f32
    %20 = vector.broadcast %cst_11 : f32 to vector<8x128xf32>
    %21 = arith.select %18, %10, %20 : vector<8x128xi1>, vector<8x128xf32>
    %cst_12 = arith.constant dense<0.000000e+00> : vector<8xf32>
    %22 = vector.multi_reduction <add>, %21, %cst_12 [1] : vector<8x128xf32> to vector<8xf32>
    %23 = vector.shape_cast %22 : vector<8xf32> to vector<8x1xf32>
    %24 = arith.addf %19, %23 : vector<8x1xf32>
    %c0_13 = arith.constant 0 : index
    %c0_14 = arith.constant 0 : index
    %25 = vector.load %arg8[%c0_13, %c0_14] : memref<8x1xf32, #tpu.memory_space<vmem>>, vector<8x1xf32>
    tpu.vector_store %arg8[%c0_13, %c0_14], %24 {strides = array<i32>} : memref<8x1xf32, #tpu.memory_space<vmem>>, vector<8x1xf32>,
    %c0_15 = arith.constant 0 : index
    %c0_16 = arith.constant 0 : index
    %26 = vector.load %arg9[%c0_15, %c0_16] : memref<8x1xf32, #tpu.memory_space<vmem>>, vector<8x1xf32>
    %cst_17 = arith.constant 0x7F800000 : f32
    %27 = vector.broadcast %cst_17 : f32 to vector<8x128xf32>
    %28 = arith.select %18, %27, %10 : vector<8x128xi1>, vector<8x128xf32>
    %cst_18 = arith.constant dense<0x7F800000> : vector<8xf32>
    %29 = vector.multi_reduction <minimumf>, %28, %cst_18 [1] : vector<8x128xf32> to vector<8xf32>
    %30 = vector.shape_cast %29 : vector<8xf32> to vector<8x1xf32>
    %31 = arith.minimumf %26, %30 : vector<8x1xf32>
    %c0_19 = arith.constant 0 : index
    %c0_20 = arith.constant 0 : index
    %32 = vector.load %arg9[%c0_19, %c0_20] : memref<8x1xf32, #tpu.memory_space<vmem>>, vector<8x1xf32>
    tpu.vector_store %arg9[%c0_19, %c0_20], %31 {strides = array<i32>} : memref<8x1xf32, #tpu.memory_space<vmem>>, vector<8x1xf32>,
    %c0_i32_21 = arith.constant 0 : i32
    %33 = arith.cmpi eq, %arg1, %c0_i32_21 : i32
    %34 = arith.extui %33 : i1 to i32
    %c0_i32_22 = arith.constant 0 : i32
    %35 = arith.cmpi ne, %34, %c0_i32_22 : i32
    scf.if %35 {
      %c0_23 = arith.constant 0 : index
      %c0_24 = arith.constant 0 : index
      %36 = vector.load %arg3[%c0_23, %c0_24] : memref<8x32xf32, #tpu.memory_space<vmem>>, vector<8x32xf32>
      %37 = arith.mulf %36, %36 : vector<8x32xf32>
      %cst_25 = arith.constant dense<0.000000e+00> : vector<8xf32>
      %38 = vector.multi_reduction <add>, %37, %cst_25 [1] : vector<8x32xf32> to vector<8xf32>
      %39 = vector.shape_cast %38 : vector<8xf32> to vector<8x1xf32>
      %c0_26 = arith.constant 0 : index
      %c0_27 = arith.constant 0 : index
      %40 = vector.load %arg8[%c0_26, %c0_27] : memref<8x1xf32, #tpu.memory_space<vmem>>, vector<8x1xf32>
      %41 = arith.addf %40, %39 : vector<8x1xf32>
      %cst_28 = arith.constant 0.000000e+00 : f32
      %42 = vector.broadcast %cst_28 : f32 to vector<8x1xf32>
      %43 = arith.maximumf %41, %42 : vector<8x1xf32>
      %c0_29 = arith.constant 0 : index
      %c0_30 = arith.constant 0 : index
      %44 = vector.load %arg9[%c0_29, %c0_30] : memref<8x1xf32, #tpu.memory_space<vmem>>, vector<8x1xf32>
      %45 = arith.addf %44, %39 : vector<8x1xf32>
      %cst_31 = arith.constant 0.000000e+00 : f32
      %46 = vector.broadcast %cst_31 : f32 to vector<8x1xf32>
      %47 = arith.maximumf %45, %46 : vector<8x1xf32>
      %48 = arith.subf %43, %47 : vector<8x1xf32>
      %49 = arith.addf %43, %47 : vector<8x1xf32>
      %50 = arith.divf %48, %49 : vector<8x1xf32>
      %c0_32 = arith.constant 0 : index
      %c0_33 = arith.constant 0 : index
      %51 = memref.load %arg2[%c0_32, %c0_33] : memref<1x1xf32, #tpu.memory_space<smem>>
      %52 = vector.broadcast %51 : f32 to vector<8x1xf32>
      %53 = arith.mulf %52, %50 : vector<8x1xf32>
      %54 = math.exp %53 : vector<8x1xf32>
      %cst_34 = arith.constant 1.000000e+00 : f32
      %55 = vector.broadcast %cst_34 : f32 to vector<8x1xf32>
      %56 = arith.addf %55, %54 : vector<8x1xf32>
      %cst_35 = arith.constant 1.000000e+00 : f32
      %57 = vector.broadcast %cst_35 : f32 to vector<8x1xf32>
      %58 = arith.divf %57, %56 : vector<8x1xf32>
      %59 = tpu.iota {dimensions = array<i32: 0>} : vector<8x1xi32>
      %c8_i32 = arith.constant 8 : i32
      %60 = arith.muli %arg0, %c8_i32 : i32
      %61 = vector.broadcast %60 : i32 to vector<8x1xi32>
      %62 = arith.addi %59, %61 : vector<8x1xi32>
      %c8_i32_36 = arith.constant 8 : i32
      %63 = vector.broadcast %c8_i32_36 : i32 to vector<8x1xi32>
      %64 = arith.cmpi slt, %62, %63 : vector<8x1xi32>
      %cst_37 = arith.constant 0.000000e+00 : f32
      %65 = vector.broadcast %cst_37 : f32 to vector<8x1xf32>
      %66 = arith.select %64, %58, %65 : vector<8x1xi1>, vector<8x1xf32>
      %67 = vector.shape_cast %66 : vector<8x1xf32> to vector<1x8x1xf32>
      %cst_38 = arith.constant dense<0.000000e+00> : vector<1xf32>
      %68 = vector.multi_reduction <add>, %67, %cst_38 [1, 2] : vector<1x8x1xf32> to vector<1xf32>
      %69 = vector.shape_cast %68 : vector<1xf32> to vector<1x1x1xf32>
      %70 = vector.extract %69[0, 0, 0] : f32 from vector<1x1x1xf32>
      %c0_39 = arith.constant 0 : index
      %c0_40 = arith.constant 0 : index
      %71 = memref.load %arg7[%c0_39, %c0_40] : memref<1x1xf32, #tpu.memory_space<smem>>
      memref.store %70, %arg7[%c0_39, %c0_40] : memref<1x1xf32, #tpu.memory_space<smem>>
    } else {
    }
    return
  }
  func.func @transform_0(%arg0: i32, %arg1: i32) -> (i32, i32) {
    %c0_i32 = arith.constant 0 : i32
    %c0_i32_0 = arith.constant 0 : i32
    %c0_i32_1 = arith.constant 0 : i32
    return %c0_i32, %c0_i32_0 : i32, i32
  }
  func.func @transform_1(%arg0: i32, %arg1: i32) -> (i32, i32) {
    %c0_i32 = arith.constant 0 : i32
    %c0_i32_0 = arith.constant 0 : i32
    return %arg0, %c0_i32 : i32, i32
  }
  func.func @transform_2(%arg0: i32, %arg1: i32) -> (i32, i32) {
    %c0_i32 = arith.constant 0 : i32
    %c0_i32_0 = arith.constant 0 : i32
    return %c0_i32, %arg1 : i32, i32
  }
  func.func @transform_3(%arg0: i32, %arg1: i32) -> (i32, i32) {
    %c0_i32 = arith.constant 0 : i32
    %c0_i32_0 = arith.constant 0 : i32
    return %c0_i32, %arg1 : i32, i32
  }
  func.func @transform_4(%arg0: i32, %arg1: i32) -> (i32, i32) {
    %c0_i32 = arith.constant 0 : i32
    %c0_i32_0 = arith.constant 0 : i32
    return %arg0, %c0_i32 : i32, i32
  }
  func.func @transform_5(%arg0: i32, %arg1: i32) -> (i32, i32) {
    %c0_i32 = arith.constant 0 : i32
    %c0_i32_0 = arith.constant 0 : i32
    return %arg0, %c0_i32 : i32, i32
  }
}

</mosaic_0001>

<bundles_post_ra>
// kernel: tpu_custom_call.1
= control target key start
LH: loop header
LB: loop body
LE: loop exit
PB: predicated region body
PF: predicated region fallthrough
CT: control target
= control target key end

     0   :  { %11 = vsyncpa [#allocation6], 0  ;;  %s373_s0 = inlined_call_operand.<no memory space> [shape: f32[1,1], index: 0, kind: input, shape index: {}]   ;;  %s374_s1 = inlined_call_operand.vmem [shape: f32[8,32], index: 1, kind: input, shape index: {}]   ;;  %s375_s2 = inlined_call_operand.hbm [shape: f32[32,128], index: 2, kind: input, shape index: {}]   ;;  %s376_s3 = inlined_call_operand.vmem [shape: f32[1,128], index: 3, kind: input, shape index: {}]   ;;  %s377_s4 = inlined_call_operand.vmem [shape: s32[8,1], index: 4, kind: input, shape index: {}]   ;;  %s378_s5 = inlined_call_operand.hbm [shape: f32[1,1], index: 5, kind: output, shape index: {}]  }
   0x1   :  { %12 = vsyncpa [#allocation7], 0  ;;  %s291_s18 = smov [#allocation5]   ;;  %s255_s22 = scalar_lea.hbm %s375_s2, 512 }
   0x2   :  { %s22_s19 = sshll.u32 %s291_s18, 4  ;;  %p256_p0 = scmp.ne.s32.totalorder %s375_s2, %s255_s22  ;;  %s23_s19 = int_to_ptr.vmem [resolvable:$true] %s22_s19 }
   0x3   :  { %p259_p1 = scmp.lt.u32.totalorder %s255_s22, %s375_s2 }
   0x5   :  { %p261_p2 = pnand %p259_p1, %p256_p0 }
   0x7   :  { %264 = shalt.err (!%p261_p2)
}
   0x8   :  { %s265_s27 = scalar_lea.vmem %s23_s19, 512  ;;  %p270_p4 = scmp.lt.s32.totalorder %s23_s19, %s23_s19 }
   0x9   :  { %p266_p3 = scmp.ne.s32.totalorder %s23_s19, %s265_s27  ;;  %p271_p5 = scmp.lt.s32.totalorder %s265_s27, %s265_s27 }
   0xb   :  { %p272_p6 = por %p271_p5, %p270_p4 }
   0xd   :  { %p273_p7 = pnand %p272_p6, %p266_p3 }
   0xf   :  { %276 = shalt.err (!%p273_p7)
}
  0x10   :  { %s292_s28 = smov 128   ;;  %s293_s29 = smov 8  }
  0x11   :  { %28 = dma.hbm_to_vmem [thread:$0]  %s375_s2, 512, %s23_s19, [#allocation6], %s292_s28, %s292_s28, %s293_s29  }
  0x12   :  { %287 = dma.done.wait [#allocation6], 512  }
  0x13   :  { %288 = vsyncadd [#allocation6], 4294966784  ;;  %vm40_vm0 = vcmask 7168   ;;  %v294_v0 = vmov 0.0|0.0   ;;  %v295_v1 = vmov 0.0   ;;  %vm296_vm1 = vmmov 0  }
  0x14   :  { %231 = vmatprep.subr.bf16.mxu0 %v294_v0  ;;  %41 = vst.msk [vmem:[#allocation2] sm:$0xff] %vm40_vm0, %v295_v1  ;;  %228 = vmatprep.mubr.msk.f32.mxu0 %vm296_vm1, %v295_v1  ;;  %v297_v2 = vmov 0   ;;  %v44_v3 = vld [vmem:[#allocation5] sm:$0xff]  ;;  %v45_v4 = vld [vmem:[#allocation5 + $0x8] sm:$0xff]  ;;  %v46_v5 = vld [vmem:[#allocation5 + $0x10] sm:$0xff]  ;;  %vm48_vm2 = vcmask 261120   ;;  %v131_v12 = vlaneseq  ;;  %v173_v40 = vstv %s373_s0 }
  0x15   :  { %248 = vset.pattern.permute.xlu0 %v297_v2  ;;  %v232_v6 = vpack.c.bf16 %v45_v4, %v44_v3  ;;  %v47_v7 = vld [vmem:[#allocation5 + $0x18] sm:$0xff]  ;;  %v136_v8 = vld [vmem:[%s377_s4] sm:$0xff]  ;;  %v298_v11 = vmov inf   ;;  %s277_s13 = scalar_lea.hbm %s378_s5, 16 }
  0x16   :  { %138 = vperm.xlu0 %248, %v136_v8   ;;  %v235_v9 = vpack.c.bf16 %v47_v7, %v46_v5  ;;  %v43_v10 = vld [vmem:[%s374_s1] sm:$0xff]  ;;  %42 = vst.msk [vmem:[#allocation3] sm:$0xff] %vm40_vm0, %v298_v11  ;;  %v132_v13 = vand.u32 127, %v131_v12  ;;  %p278_p8 = scmp.ne.s32.totalorder %s378_s5, %s277_s13  ;;  %p281_p9 = scmp.lt.u32.totalorder %s277_s13, %s378_s5 }
  0x17   :  { %233 = vmatpush3.bf16.msra.mxu0 %v232_v6  ;;  %v214_v16 = vld [vmem:[%s376_s3] ss:$0 sm:$0xff]  ;;  %v158_v20 = vmul.f32 %v43_v10, %v43_v10 }
  0x18   :  { %234 = vmatprep.subr.bf16.mxu0 %v294_v0  ;;  %p283_p10 = pnand %p281_p9, %p278_p8 }
  0x19   :  { %v159_v23 = vsel %vm48_vm2, %v158_v20, 0.0 }
  0x1b   :  { %236 = vmatpush3.bf16.msra.mxu0 %v235_v9  ;;  %v141_v25 = vld [vmem:[#allocation2] sm:$0xff] }
  0x1d   :  { %v148_v24 = vld [vmem:[#allocation3] sm:$0xff] }
  0x1e   :  { %229 = vmatmul.mubr.msk.f32.vlgmr.msra.gmra.mrb[0].mxu0 %vm48_vm2, %v43_v10 }
  0x95   :  { %v139_v14 = vpop.permute.xlu0 %138 }
  0x96   :  { %vm140_vm3 = vcmp.eq.s32.totalorder %v132_v13, %v139_v14 }
  0xf1   :  { %v118_v15 = vpop.f32.mrb[0].mxu0 }
  0xf2   :  { %v123_v17 = vmul.f32 2.0, %v118_v15  ;;  %v230_v18 = vpop.f32.mrb[1].mxu0 }
  0xf4   :  { %v130_v19 = vsub.f32 %v214_v16, %v123_v17 }
  0xf6   :  { %v149_v21 = vsel %vm140_vm3, inf, %v130_v19  ;;  %v142_v22 = vsel %vm140_vm3, %v130_v19, 0.0 }
  0xf7   :  { %150 = vmin.xlane.f32.xlu1 %v149_v21  ;;  %143 = vadd.xlane.f32.xlu0 %v142_v22 }
  0xfb   :  { %160 = vadd.xlane.f32.xlu1 %v159_v23 }
 0x184   :  { %v151_v26 = vpop.xlane.xlu1 %150  ;;  %v144_v27 = vpop.xlane.xlu0 %143 }
 0x185   :  { %v152_v28 = vmin.f32 %v148_v24, %v151_v26  ;;  %v145_v29 = vadd.f32 %v144_v27, %v141_v25 }
 0x187   :  { %153 = vst.msk [vmem:[#allocation3] sm:$0xff] %vm40_vm0, %v152_v28  ;;  %147 = vst.msk [vmem:[#allocation2] sm:$0xff] %vm40_vm0, %v145_v29 }
 0x188   :  { %v161_v30 = vpop.xlane.xlu1 %160 }
 0x18e   :  { %v162_v31 = vld [vmem:[#allocation2] sm:$0xff]  ;;  %v165_v32 = vld [vmem:[#allocation3] sm:$0xff] }
 0x18f   :  { %v163_v33 = vadd.f32 %v162_v31, %v161_v30  ;;  %v166_v34 = vadd.f32 %v165_v32, %v161_v30 }
 0x191   :  { %v164_v35 = vmax.f32 %v163_v33, 0.0  ;;  %v167_v36 = vmax.f32 %v166_v34, 0.0 }
 0x193   :  { %v169_v37 = vadd.f32 %v167_v36, %v164_v35  ;;  %v168_v38 = vsub.f32 %v164_v35, %v167_v36 }
 0x195   :  { %249 = vrcp.f32 %v169_v37 }
 0x19f   :  { %v250_v39 = vpop.eup %249 }
 0x1a0   :  { %v171_v41 = vmul.f32 %v250_v39, %v168_v38 }
 0x1a2   :  { %v174_v42 = vmul.f32 %v173_v40, %v171_v41 }
 0x1a4   :  { %v175_v43 = vmul.f32 1.442695, %v174_v42 }
 0x1a6   :  { %251 = vpow2.f32 %v175_v43 }
 0x1b0   :  { %v252_v44 = vpop.eup %251 }
 0x1b1   :  { %v177_v45 = vadd.f32 1.0, %v252_v44 }
 0x1b3   :  { %253 = vrcp.f32 %v177_v45 }
 0x1bd   :  { %v254_v46 = vpop.eup %253 }
 0x1be   :  { %v187_v47 = vsel %vm40_vm0, %v254_v46, 0.0 }
 0x1bf   :  { %188 = vadd.xlane.f32.xlu1 %v187_v47 }
 0x24c   :  { %v189_v48 = vpop.xlane.xlu1 %188 }
 0x24d   :  { %v190_v49 = vrot.slane %v189_v48, 4 }
 0x24f   :  { %v191_v50 = vadd.f32 %v190_v49, %v189_v48 }
 0x251   :  { %v192_v51 = vrot.slane %v191_v50, 2 }
 0x253   :  { %v193_v52 = vadd.f32 %v192_v51, %v191_v50 }
 0x255   :  { %v194_v53 = vrot.slane %v193_v52, 1 }
 0x257   :  { %v195_v54 = vadd.f32 %v194_v53, %v193_v52 }
 0x259   :  { %237 = vpush %v195_v54 }
 0x28a   :  { %s238_s0 = spop %237 }
 0x28b   :  { %198 = sst [smem:[#allocation8]] %s238_s0 }
 0x28c   :  { %286 = shalt.err (!%p283_p10)
}
 0x28d   :  { %s299_s18 = smov [#allocation8]  }
 0x28e   :  { %206 = dma.smem_to_hbm %s299_s18, 16, %s378_s5, [#allocation7]  }
 0x28f   :  { %289 = dma.done.wait [#allocation7], 16  }
 0x290   :  { %290 = vsyncadd [#allocation7], 4294967280 }
 0x291   :  { %210 = sfence }
 0x292   :  { %211 = vsyncpa [#allocation6], 1 }
 0x293   :  { %212 = vsyncpa [#allocation7], 1 }

</bundles_post_ra>
